<compile_context>
chip_gen: v7x
topology: tpu7x:2x2x1
jax: 0.10.0
libtpu: 0.0.40
codegen_flags: <defaults>
</compile_context>

<pallas_src>
import functools

import jax
import jax.numpy as jnp
from jax.experimental import pallas as pl
from jax.experimental.pallas import tpu as pltpu

MARGIN = 2.0
_EPS = 1e-6  # F.pairwise_distance default eps (added to every diff component).


def _contrastive_loss_kernel(o1_ref, o2_ref, label_ref, out_ref, acc_ref, *,
                             margin, batch, feat, block_b, block_d, d_tiles):
    i = pl.program_id(0)                                   # batch tile ("parallel")

    # Upcast in vregs (inputs may be bf16); all math stays f32.
    # NOTE: adding eps to every component of the difference intentionally
    # reproduces torch F.pairwise_distance — do not "fix" it.
    diff = (o1_ref[...].astype(jnp.float32)
            - o2_ref[...].astype(jnp.float32) + _EPS)      # [TB, TD]

    if d_tiles > 1:
        k = pl.program_id(1)                               # feature tile ("arbitrary")
        # Mask ragged feature-tail columns (they hold unspecified data).
        col = jax.lax.broadcasted_iota(jnp.int32, diff.shape, 1) + k * block_d
        diff = jnp.where(col < feat, diff, 0.0)

    psum = jnp.sum(diff * diff, axis=1, keepdims=True)     # [TB, 1]

    if d_tiles > 1:
        @pl.when(k == 0)
        def _():
            acc_ref[...] = jnp.zeros_like(acc_ref)
        acc_ref[...] += psum

    def _finalize():
        sumsq = acc_ref[...] if d_tiles > 1 else psum      # [TB, 1] == d^2
        d = jnp.sqrt(sumsq)                                # sqrt only for hinge
        label = label_ref[...].astype(jnp.float32)         # [TB, 1]
        hinge = jnp.maximum(margin - d, 0.0)
        per_row = (1.0 - label) * sumsq + label * (hinge * hinge)
        # Mask ragged batch-tail rows (padded rows hold unspecified data; any
        # NaN/Inf there must not leak into the partial sum).
        row = jax.lax.broadcasted_iota(jnp.int32, per_row.shape, 0) + i * block_b
        per_row = jnp.where(row < batch, per_row, 0.0)
        partial = jnp.sum(per_row, axis=0, keepdims=True)  # (1, 1)
        # One lane-dense, unmasked (8,128) store per batch tile.
        out_ref[...] = jnp.broadcast_to(partial, out_ref.shape)

    if d_tiles > 1:
        pl.when(pl.program_id(1) == d_tiles - 1)(_finalize)
    else:
        _finalize()


def _vmem_capacity_bytes():
    try:
        return int(pltpu.get_tpu_info().vmem_capacity_bytes)
    except Exception:
        return 64 * 1024 * 1024  # be conservative: smallest generation (v7x per-TC)


def _pick_blocks(B, D, itemsize, phys):
    """Choose (TB, TD, d_tiles) from the VMEM budget (bytes-only policy)."""
    # Usable budget for pipeline buffers + temporaries; ~45% headroom for the
    # compiler's own scratch and layout padding.
    budget = int(phys * 0.55)
    # Per-input block ceiling: fewer, larger grid steps amortize the ~0.35us
    # per-step overhead (mem-bound kernels plateau ~85% of roofline at big blocks).
    max_block_bytes = min(8 * 1024 * 1024, budget // 6)

    # Feature (lane) axis: keep full D whenever >=8 rows fit; otherwise tile D
    # in multiples of 128 and reduce through the VMEM accumulator.
    if 8 * D * itemsize <= max_block_bytes:
        TD, d_tiles = D, 1
    else:
        TD = max(128, (max_block_bytes // (8 * itemsize)) // 128 * 128)
        d_tiles = pl.cdiv(D, TD)

    # Batch (sublane) axis: per-row cost = 2 inputs x 2 pipeline buffers in the
    # native dtype + ~2 f32-sized intermediates + lane-padded label/acc rows.
    per_row = TD * (4 * itemsize + 2 * 4) + 3 * 128 * 4
    rows_by_budget = budget // per_row
    rows_by_block = max_block_bytes // max(1, TD * itemsize)
    TB = max(8, (min(rows_by_budget, rows_by_block) // 8) * 8)

    if TB >= B:
        if B > 256:
            # Keep >=2 grid points so both v7x TensorCores stream (the batch
            # axis is "parallel"); costs one ~0.35us step on single-TC chips.
            TB = max(8, ((pl.cdiv(B, 2) + 7) // 8) * 8)
        else:
            TB = B
    return TB, TD, d_tiles


def _vmem_limit_bytes(phys, TB, TD, itemsize):
    need = (4 * TB * TD * itemsize      # 2 inputs x 2 pipeline buffers
            + 2 * TB * TD * 4           # f32 upcast / diff / diff^2 temporaries
            + 3 * TB * 128 * 4          # lane-padded label buffers + accumulator
            + 4 * 8 * 128 * 4)          # output blocks
    return int(max(32 * 1024 * 1024,
                   min(int(phys * 0.9), need + 16 * 1024 * 1024)))


def contrastive_loss(output1, output2, label, margin=MARGIN,
                     block_b=None, block_d=None):
    """output1, output2: [B, D] (f32 or bf16); label: [B]. Returns scalar f32."""
    B, D = output1.shape
    itemsize = jnp.dtype(output1.dtype).itemsize
    phys = _vmem_capacity_bytes()

    TB, TD, d_tiles = _pick_blocks(B, D, itemsize, phys)
    if block_b is not None:
        TB = B if block_b >= B else max(8, (block_b // 8) * 8)
    if block_d is not None:
        if block_d >= D:
            TD, d_tiles = D, 1
        else:
            TD = max(128, (block_d // 128) * 128)
            d_tiles = pl.cdiv(D, TD)

    b_tiles = pl.cdiv(B, TB)
    vmem_limit = _vmem_limit_bytes(phys, TB, TD, itemsize)
    label2d = label.reshape(B, 1)

    kernel = functools.partial(
        _contrastive_loss_kernel, margin=float(margin), batch=B, feat=D,
        block_b=TB, block_d=TD, d_tiles=d_tiles)

    cost = pl.CostEstimate(
        flops=4 * B * D + 10 * B,
        transcendentals=B,
        bytes_accessed=2 * B * D * itemsize
        + B * jnp.dtype(label2d.dtype).itemsize
        + b_tiles * 8 * 128 * 4,
    )

    per_tile = pl.pallas_call(
        kernel,
        out_shape=jax.ShapeDtypeStruct((b_tiles * 8, 128), jnp.float32),
        grid=(b_tiles, d_tiles),
        in_specs=[
            pl.BlockSpec((TB, TD), lambda i, k: (i, k)),
            pl.BlockSpec((TB, TD), lambda i, k: (i, k)),
            pl.BlockSpec((TB, 1), lambda i, k: (i, 0)),
        ],
        out_specs=pl.BlockSpec((8, 128), lambda i, k: (i, 0)),
        scratch_shapes=[pltpu.VMEM((TB, 1), jnp.float32)],
        compiler_params=pltpu.CompilerParams(
            dimension_semantics=("parallel", "arbitrary"),
            vmem_limit_bytes=vmem_limit),
        cost_estimate=cost,
    )(output1, output2, label2d)

    # Every element of a tile's (8,128) output block equals that tile's partial
    # sum; pick one per tile, sum, divide by the *global* B (== torch.mean).
    partials = per_tile.reshape(b_tiles, 8 * 128)[:, 0]
    return jnp.sum(partials) / jnp.float32(B)


def _reference_loss(output1, output2, label, margin=MARGIN):
    # Pure-JAX reference mirroring the PyTorch forward.
    d = jnp.sqrt(jnp.sum((output1 - output2 + _EPS) ** 2, axis=1))
    return jnp.mean((1.0 - label) * d**2 +
                    label * jnp.maximum(margin - d, 0.0) ** 2)


if __name__ == "__main__":
    key = jax.random.PRNGKey(0)
    k1, k2, k3 = jax.random.split(key, 3)

    # 1) Small shapes consistent with the module (embedding pairs + binary labels).
    B, D = 8, 32
    output1 = jax.random.normal(k1, (B, D), dtype=jnp.float32)
    output2 = jax.random.normal(k2, (B, D), dtype=jnp.float32)
    label = jax.random.bernoulli(k3, 0.5, (B,)).astype(jnp.float32)
    loss = jax.block_until_ready(contrastive_loss(output1, output2, label))
    ref = jax.block_until_ready(_reference_loss(output1, output2, label))
    assert jnp.allclose(loss, ref, rtol=1e-5, atol=1e-5), (loss, ref)

    # 2) Multi-tile + ragged batch tail (3 blocks of 16 rows over B=40).
    B2, D2 = 40, 128
    kk1, kk2, kk3 = jax.random.split(jax.random.PRNGKey(1), 3)
    p1 = jax.random.normal(kk1, (B2, D2), dtype=jnp.float32)
    p2 = jax.random.normal(kk2, (B2, D2), dtype=jnp.float32)
    lab2 = jax.random.bernoulli(kk3, 0.5, (B2,)).astype(jnp.float32)
    loss2 = jax.block_until_ready(contrastive_loss(p1, p2, lab2, block_b=16))
    ref2 = jax.block_until_ready(_reference_loss(p1, p2, lab2))
    assert jnp.allclose(loss2, ref2, rtol=1e-5, atol=1e-5), (loss2, ref2)

    # 3) bf16 inputs: no host-side upcast, kernel upcasts in vregs.
    b1 = p1.astype(jnp.bfloat16)
    b2 = p2.astype(jnp.bfloat16)
    loss3 = jax.block_until_ready(contrastive_loss(b1, b2, lab2))
    ref3 = jax.block_until_ready(
        _reference_loss(b1.astype(jnp.float32), b2.astype(jnp.float32), lab2))
    assert jnp.allclose(loss3, ref3, rtol=1e-3, atol=1e-3), (loss3, ref3)

    # 4) Feature-axis tiling path with ragged D (320 = 128+128+64) and ragged batch.
    B3, D3 = 24, 320
    j1, j2, j3 = jax.random.split(jax.random.PRNGKey(2), 3)
    q1 = jax.random.normal(j1, (B3, D3), dtype=jnp.float32)
    q2 = jax.random.normal(j2, (B3, D3), dtype=jnp.float32)
    lab3 = jax.random.bernoulli(j3, 0.5, (B3,)).astype(jnp.float32)
    loss4 = jax.block_until_ready(
        contrastive_loss(q1, q2, lab3, block_b=16, block_d=128))
    ref4 = jax.block_until_ready(_reference_loss(q1, q2, lab3))
    assert jnp.allclose(loss4, ref4, rtol=1e-5, atol=1e-5), (loss4, ref4)

    print("KERNEL_OK")
</pallas_src>

<mosaic_0001>
module attributes {stable_mosaic.version = 11 : i64} {
  func.func @_contrastive_loss_kernel(%arg0: i32, %arg1: i32, %arg2: memref<8x32xf32, #tpu.memory_space<vmem>>, %arg3: memref<8x32xf32, #tpu.memory_space<vmem>>, %arg4: memref<8x1xf32, #tpu.memory_space<vmem>>, %arg5: memref<8x128xf32, #tpu.memory_space<vmem>>, %arg6: memref<8x1xf32, #tpu.memory_space<vmem>>) attributes {dimension_semantics = [#tpu.dimension_semantics<parallel>, #tpu.dimension_semantics<arbitrary>], iteration_bounds = array<i64: 1, 1>, scalar_prefetch = 0 : i64, scratch_operands = 1 : i64, tpu.core_type = #tpu.core_type<tc>, window_params = [{transform_indices = @transform_0, window_bounds = array<i64: 8, 32>}, {transform_indices = @transform_1, window_bounds = array<i64: 8, 32>}, {transform_indices = @transform_2, window_bounds = array<i64: 8, 1>}, {transform_indices = @transform_3, window_bounds = array<i64: 8, 128>}]} {
    %c0 = arith.constant 0 : index
    %c0_0 = arith.constant 0 : index
    %0 = vector.load %arg2[%c0, %c0_0] : memref<8x32xf32, #tpu.memory_space<vmem>>, vector<8x32xf32>
    %c0_1 = arith.constant 0 : index
    %c0_2 = arith.constant 0 : index
    %1 = vector.load %arg3[%c0_1, %c0_2] : memref<8x32xf32, #tpu.memory_space<vmem>>, vector<8x32xf32>
    %2 = arith.subf %0, %1 : vector<8x32xf32>
    %cst = arith.constant 9.99999997E-7 : f32
    %3 = vector.broadcast %cst : f32 to vector<8x32xf32>
    %4 = arith.addf %2, %3 : vector<8x32xf32>
    %5 = arith.mulf %4, %4 : vector<8x32xf32>
    %cst_3 = arith.constant dense<0.000000e+00> : vector<8xf32>
    %6 = vector.multi_reduction <add>, %5, %cst_3 [1] : vector<8x32xf32> to vector<8xf32>
    %7 = vector.shape_cast %6 : vector<8xf32> to vector<8x1xf32>
    %8 = math.sqrt %7 : vector<8x1xf32>
    %c0_4 = arith.constant 0 : index
    %c0_5 = arith.constant 0 : index
    %9 = vector.load %arg4[%c0_4, %c0_5] : memref<8x1xf32, #tpu.memory_space<vmem>>, vector<8x1xf32>
    %cst_6 = arith.constant 2.000000e+00 : f32
    %10 = vector.broadcast %cst_6 : f32 to vector<8x1xf32>
    %11 = arith.subf %10, %8 : vector<8x1xf32>
    %cst_7 = arith.constant 0.000000e+00 : f32
    %12 = vector.broadcast %cst_7 : f32 to vector<8x1xf32>
    %13 = arith.maximumf %11, %12 : vector<8x1xf32>
    %cst_8 = arith.constant 1.000000e+00 : f32
    %14 = vector.broadcast %cst_8 : f32 to vector<8x1xf32>
    %15 = arith.subf %14, %9 : vector<8x1xf32>
    %16 = arith.mulf %15, %7 : vector<8x1xf32>
    %17 = arith.mulf %13, %13 : vector<8x1xf32>
    %18 = arith.mulf %9, %17 : vector<8x1xf32>
    %19 = arith.addf %16, %18 : vector<8x1xf32>
    %20 = tpu.iota {dimensions = array<i32: 0>} : vector<8x1xi32>
    %c8_i32 = arith.constant 8 : i32
    %21 = arith.muli %arg0, %c8_i32 : i32
    %22 = vector.broadcast %21 : i32 to vector<8x1xi32>
    %23 = arith.addi %20, %22 : vector<8x1xi32>
    %c8_i32_9 = arith.constant 8 : i32
    %24 = vector.broadcast %c8_i32_9 : i32 to vector<8x1xi32>
    %25 = arith.cmpi slt, %23, %24 : vector<8x1xi32>
    %cst_10 = arith.constant 0.000000e+00 : f32
    %26 = vector.broadcast %cst_10 : f32 to vector<8x1xf32>
    %27 = arith.select %25, %19, %26 : vector<8x1xi1>, vector<8x1xf32>
    %cst_11 = arith.constant dense<0.000000e+00> : vector<1xf32>
    %28 = vector.multi_reduction <add>, %27, %cst_11 [0] : vector<8x1xf32> to vector<1xf32>
    %29 = vector.shape_cast %28 : vector<1xf32> to vector<1x1xf32>
    %30 = vector.shape_cast %29 : vector<1x1xf32> to vector<1x1xf32>
    %31 = vector.broadcast %30 : vector<1x1xf32> to vector<8x128xf32>
    %c0_12 = arith.constant 0 : index
    %c0_13 = arith.constant 0 : index
    %32 = vector.load %arg5[%c0_12, %c0_13] : memref<8x128xf32, #tpu.memory_space<vmem>>, vector<8x128xf32>
    tpu.vector_store %arg5[%c0_12, %c0_13], %31 {strides = array<i32>} : memref<8x128xf32, #tpu.memory_space<vmem>>, vector<8x128xf32>,
    return
  }
  func.func @transform_0(%arg0: i32, %arg1: i32) -> (i32, i32) {
    %c0_i32 = arith.constant 0 : i32
    return %arg0, %arg1 : i32, i32
  }
  func.func @transform_1(%arg0: i32, %arg1: i32) -> (i32, i32) {
    %c0_i32 = arith.constant 0 : i32
    return %arg0, %arg1 : i32, i32
  }
  func.func @transform_2(%arg0: i32, %arg1: i32) -> (i32, i32) {
    %c0_i32 = arith.constant 0 : i32
    %c0_i32_0 = arith.constant 0 : i32
    return %arg0, %c0_i32 : i32, i32
  }
  func.func @transform_3(%arg0: i32, %arg1: i32) -> (i32, i32) {
    %c0_i32 = arith.constant 0 : i32
    %c0_i32_0 = arith.constant 0 : i32
    return %arg0, %c0_i32 : i32, i32
  }
}

</mosaic_0001>

<bundles_post_ra>
// kernel: tpu_custom_call.1
= control target key start
LH: loop header
LB: loop body
LE: loop exit
PB: predicated region body
PF: predicated region fallthrough
CT: control target
= control target key end

     0   :  { %8 = vsyncpa [#allocation4], 0  ;;  %s194_s0 = inlined_call_operand.vmem [shape: f32[8,32], index: 0, kind: input, shape index: {}]   ;;  %s195_s1 = inlined_call_operand.hbm [shape: f32[8,32], index: 1, kind: input, shape index: {}]   ;;  %s196_s2 = inlined_call_operand.vmem [shape: f32[8,1], index: 2, kind: input, shape index: {}]   ;;  %s197_s3 = inlined_call_operand.hbm [shape: f32[8,128], index: 3, kind: output, shape index: {}]  }
   0x1   :  { %9 = vsyncpa [#allocation5], 0  ;;  %s141_s12 = smov [#allocation3]   ;;  %s93_s16 = scalar_lea.hbm %s195_s1, 128 }
   0x2   :  { %s18_s13 = sshll.u32 %s141_s12, 4  ;;  %p94_p0 = scmp.ne.s32.totalorder %s195_s1, %s93_s16  ;;  %s19_s13 = int_to_ptr.vmem [resolvable:$true] %s18_s13 }
   0x3   :  { %p97_p1 = scmp.lt.u32.totalorder %s93_s16, %s195_s1 }
   0x5   :  { %p99_p2 = pnand %p97_p1, %p94_p0 }
   0x7   :  { %102 = shalt.err (!%p99_p2)
}
   0x8   :  { %s103_s21 = scalar_lea.vmem %s19_s13, 128  ;;  %p108_p4 = scmp.lt.s32.totalorder %s19_s13, %s19_s13 }
   0x9   :  { %p104_p3 = scmp.ne.s32.totalorder %s19_s13, %s103_s21  ;;  %p109_p5 = scmp.lt.s32.totalorder %s103_s21, %s103_s21 }
   0xb   :  { %p110_p6 = por %p109_p5, %p108_p4 }
   0xd   :  { %p111_p7 = pnand %p110_p6, %p104_p3 }
   0xf   :  { %114 = shalt.err (!%p111_p7)
}
  0x10   :  { %21 = dma.hbm_to_vmem [thread:$0]  %s195_s1, 128, %s19_s13, [#allocation4]  }
  0x11   :  { %137 = dma.done.wait [#allocation4], 128  }
  0x12   :  { %138 = vsyncadd [#allocation4], 4294967168  ;;  %v27_v0 = vld [vmem:[%s194_s0] sm:$0xff]  ;;  %vm32_vm0 = vcmask 261120   ;;  %v142_v6 = vmov 0   ;;  %vm58_vm3 = vcmask 7168  }
  0x13   :  { %v28_v1 = vld [vmem:[#allocation3] sm:$0xff]  ;;  %90 = vset.pattern.permute.xlu0 %v142_v6  ;;  %s143_s26 = smov [#allocation6]  }
  0x14   :  { %v29_v2 = vsub.f32 %v27_v0, %v28_v1  ;;  %v43_v13 = vld [vmem:[%s196_s2] sm:$0xff]  ;;  %s78_s27 = sshll.u32 %s143_s26, 4  ;;  %s79_s27 = int_to_ptr.vmem [resolvable:$true] %s78_s27 }
  0x15   :  { %v46_v16 = vsub.f32 1.0, %v43_v13  ;;  %s115_s2 = scalar_lea.vmem %s79_s27, 128  ;;  %p120_p9 = scmp.lt.s32.totalorder %s79_s27, %s79_s27 }
  0x16   :  { %v30_v3 = vadd.f32 1e-06, %v29_v2  ;;  %p116_p8 = scmp.ne.s32.totalorder %s79_s27, %s115_s2  ;;  %p121_p10 = scmp.lt.s32.totalorder %s115_s2, %s115_s2 }
  0x18   :  { %v31_v4 = vmul.f32 %v30_v3, %v30_v3  ;;  %p122_p11 = por %p121_p10, %p120_p9 }
  0x1a   :  { %v33_v5 = vsel %vm32_vm0, %v31_v4, 0.0  ;;  %p123_p12 = pnand %p122_p11, %p116_p8 }
  0x1b   :  { %34 = vadd.xlane.f32.xlu0 %v33_v5 }
  0xa8   :  { %v35_v7 = vpop.xlane.xlu0 %34 }
  0xa9   :  { %91 = vrsqrt.f32 %v35_v7  ;;  %vm38_vm1 = vcmp.eq.f32.partialorder %v35_v7, inf  ;;  %v41_v10 = vand.u32 2147483648, %v35_v7  ;;  %vm40_vm2 = vcmp.eq.f32.partialorder %v35_v7, 0.0 }
  0xaa   :  { %v47_v18 = vmul.f32 %v46_v16, %v35_v7 }
  0xb3   :  { %v92_v8 = vpop.eup %91 }
  0xb4   :  { %v37_v9 = vmul.f32 %v92_v8, %v35_v7 }
  0xb6   :  { %v39_v11 = vsel %vm38_vm1, %v35_v7, %v37_v9 }
  0xb7   :  { %v42_v12 = vsel %vm40_vm2, %v41_v10, %v39_v11 }
  0xb8   :  { %v44_v14 = vsub.f32 2.0, %v42_v12 }
  0xba   :  { %v45_v15 = vmax.f32 %v44_v14, 0.0 }
  0xbc   :  { %v48_v17 = vmul.f32 %v45_v15, %v45_v15 }
  0xbe   :  { %v49_v19 = vmul.f32 %v48_v17, %v43_v13 }
  0xc0   :  { %v50_v20 = vadd.f32 %v49_v19, %v47_v18 }
  0xc2   :  { %v59_v21 = vsel %vm58_vm3, %v50_v20, 0.0 }
  0xc3   :  { %v60_v22 = vrot.slane %v59_v21, 4 }
  0xc5   :  { %v61_v23 = vadd.f32 %v60_v22, %v59_v21 }
  0xc7   :  { %v62_v24 = vrot.slane %v61_v23, 2 }
  0xc9   :  { %v63_v25 = vadd.f32 %v62_v24, %v61_v23 }
  0xcb   :  { %v64_v26 = vrot.slane %v63_v25, 1 }
  0xcd   :  { %v65_v27 = vadd.f32 %v64_v26, %v63_v25 }
  0xcf   :  { %68 = vperm.xlu0 %90, %v65_v27  }
 0x14e   :  { %v69_v28 = vpop.permute.xlu0 %68 }
 0x14f   :  { %71 = vst [vmem:[#allocation6] sm:$0xff] %v69_v28 }
 0x150   :  { %126 = shalt.err (!%p123_p12)
}
 0x151   :  { %s127_s30 = scalar_lea.hbm %s197_s3, 128 }
 0x152   :  { %p128_p13 = scmp.ne.s32.totalorder %s197_s3, %s127_s30  ;;  %p131_p0 = scmp.lt.u32.totalorder %s127_s30, %s197_s3 }
 0x154   :  { %p133_p1 = pnand %p131_p0, %p128_p13 }
 0x156   :  { %136 = shalt.err (!%p133_p1)
}
 0x157   :  { %81 = dma.vmem_to_hbm [thread:$0]  %s79_s27, 128, %s197_s3, [#allocation5]  }
 0x158   :  { %139 = dma.done.wait [#allocation5], 128  }
 0x159   :  { %140 = vsyncadd [#allocation5], 4294967168 }
 0x15a   :  { %85 = vsyncpa [#allocation4], 1 }
 0x15b   :  { %86 = vsyncpa [#allocation5], 1 }

</bundles_post_ra>
